<compile_context>
chip_gen: v6e
topology: v6e:2x2x1
jax: 0.10.0
libtpu: 0.0.40
codegen_flags: <defaults>
</compile_context>

<pallas_src>
import jax
import jax.numpy as jnp
from jax.experimental import pallas as pl
from jax.experimental.pallas import tpu as pltpu


_DEFAULT_VMEM_BUDGET = 28 * 1024 * 1024  # double-buffered working-set target (safe on v5e/v6e/v7x)


def _round_up(x, m):
    return ((x + m - 1) // m) * m


def _round_down(x, m):
    return (x // m) * m


def _ensemble_kernel(w_ref, p_ref, o_ref):
    # w_ref: (N, 1) f32 -- same block every grid step, VMEM-resident.
    # p_ref: (N, 8, T) or (N, T) predictions tile in native dtype.
    # o_ref: (8, T) or (1, T) lane-dense output tile.
    w = w_ref[...]                                           # (N, 1)
    # Numerically stable softmax over the ensemble axis (nn.Softmax(dim=0)).
    # Recomputed per tile (tiny EUP/VPU work hidden under the DMA) so the grid
    # stays embarrassingly parallel for multi-TensorCore sharding.
    w_max = jnp.max(w, axis=0, keepdims=True)                # (1, 1)
    e = jnp.exp(w - w_max)                                   # (N, 1)
    nw = e / jnp.sum(e, axis=0, keepdims=True)               # (N, 1)
    nw = nw.reshape((w.shape[0],) + (1,) * (len(p_ref.shape) - 1))
    # Stream native dtype through the DMA, accumulate in f32 on the VPU.
    # (No MXU: a (T,4)x(4,1) matmul would waste the systolic array.)
    p = p_ref[...].astype(jnp.float32)                       # (N, 8, T) / (N, T)
    acc = jnp.sum(nw * p, axis=0)                            # (8, T) / (T,)
    o_ref[...] = acc.reshape(o_ref.shape).astype(o_ref.dtype)


def _pick_tile(n_cols, want_lanes, per_lane_bytes, budget_bytes):
    """Lane-tile size along the streamed axis (n_cols columns total)."""
    if n_cols <= 128:
        return n_cols                                  # single full-extent block
    t = _round_down(n_cols, 128)                       # never exceed the array
    t = min(t, max(128, _round_down(budget_bytes // per_lane_bytes, 128)))
    t = min(t, max(128, _round_down(want_lanes, 128)))
    # v7x: keep >= 2 grid steps so ("parallel",) can shard the batch across
    # both TensorCores; costs nothing on single-TC v5e/v6e.
    t = min(t, _round_up(pl.cdiv(n_cols, 2), 128))
    return max(128, t)


def ensemble_predictor_ensemble_major(weights, predictions_nb, *,
                                      tile_elems=512 * 1024,
                                      out_dtype=jnp.float32,
                                      vmem_budget_bytes=_DEFAULT_VMEM_BUDGET):
    """Zero-copy entry point: predictions_nb is (N, B) (ensemble-major).

    Produce predictions in this layout upstream (fuse the transpose into the
    producer) and the wrapper does only free reshapes.  Returns (B,).
    """
    N, B = predictions_nb.shape
    w2d = weights.reshape(N, 1).astype(jnp.float32)
    in_itemsize = predictions_nb.dtype.itemsize
    out_itemsize = jnp.dtype(out_dtype).itemsize

    if B % 8 == 0:
        # (8,128)-dense path: free view (N, B) -> (N, 8, C); output (8, C).
        S = 8
        C = B // 8
        # Conservative padded VMEM bytes per lane column, double-buffered
        # (bf16 sublane packing pads back to 32-bit-equivalent footprint).
        per_lane = 2 * (N * S * max(in_itemsize, 4) + S * max(out_itemsize, 4))
        T = _pick_tile(C, max(1, tile_elems // S), per_lane, vmem_budget_bytes)
        preds = predictions_nb.reshape(N, S, C)       # free reshape
        in_block, out_block = (N, S, T), (S, T)
        in_map = lambda i: (0, 0, i)
        out_map = lambda i: (0, i)
        out_shape = jax.ShapeDtypeStruct((S, C), out_dtype)
        grid = (pl.cdiv(C, T),)
    else:
        # Fallback for batches not divisible by 8: plain (N, B) streaming
        # (input pads N->8 sublanes, output (1, T) pads to 8 -- rare path).
        C = B
        per_lane = 2 * (8 * max(in_itemsize, 4) + 8 * max(out_itemsize, 4))
        T = _pick_tile(C, tile_elems, per_lane, vmem_budget_bytes)
        preds = predictions_nb
        in_block, out_block = (N, T), (1, T)
        in_map = lambda i: (0, i)
        out_map = lambda i: (0, i)
        out_shape = jax.ShapeDtypeStruct((1, C), out_dtype)
        grid = (pl.cdiv(C, T),)

    num_steps = grid[0]
    cost = pl.CostEstimate(
        flops=2 * B * N,
        transcendentals=N * num_steps,                 # softmax redone per tile
        bytes_accessed=B * N * in_itemsize + N * 4 + B * out_itemsize,
    )

    out = pl.pallas_call(
        _ensemble_kernel,
        out_shape=out_shape,
        grid_spec=pltpu.PrefetchScalarGridSpec(
            num_scalar_prefetch=0,
            grid=grid,
            in_specs=[
                # weights: same block every step -> stays resident in VMEM
                pl.BlockSpec((N, 1), lambda i: (0, 0)),
                # predictions: tile marching along the batch/lane axis
                pl.BlockSpec(in_block, in_map),
            ],
            out_specs=pl.BlockSpec(out_block, out_map),
        ),
        compiler_params=pltpu.CompilerParams(
            dimension_semantics=("parallel",),
            vmem_limit_bytes=int(vmem_budget_bytes + (4 << 20)),
        ),
        cost_estimate=cost,
    )(w2d, preds)

    return out.reshape(B)                              # free reshape back to (B,)


def ensemble_predictor(weights, predictions, **kwargs):
    """PyTorch-layout entry point: predictions is (B, N) as in forward().

    NOTE: this pays one (B, N) -> (N, B) transpose (an extra HBM pass).  For
    peak bandwidth emit predictions as (N, B) upstream and call
    ensemble_predictor_ensemble_major directly.
    """
    return ensemble_predictor_ensemble_major(weights, predictions.T, **kwargs)


if __name__ == "__main__":
    N = 4

    # --- Faithful module check: weights = ones(N), predictions (B, N) --------
    B = 8
    weights = jnp.ones((N,), dtype=jnp.float32)        # nn.Parameter(torch.ones(N))
    key = jax.random.PRNGKey(0)
    predictions = jax.random.normal(key, (B, N), dtype=jnp.float32)

    out = jax.block_until_ready(ensemble_predictor(weights, predictions))
    ref = jnp.sum(jax.nn.softmax(weights, axis=0) * predictions, axis=1)
    assert out.shape == (B,)
    assert jnp.allclose(out, ref, atol=1e-6, rtol=1e-6)

    # --- Zero-copy (N, B) path, multi-tile grid + ragged last block ----------
    B2 = 8 * 200                                       # C = 200 -> blocks 128 + 72 (ragged)
    k1, k2 = jax.random.split(jax.random.PRNGKey(1))
    preds_nb = jax.random.normal(k1, (N, B2), dtype=jnp.float32)
    w2 = jax.random.normal(k2, (N,), dtype=jnp.float32)
    out2 = jax.block_until_ready(
        ensemble_predictor_ensemble_major(w2, preds_nb, tile_elems=8 * 128))
    ref2 = jnp.sum(jax.nn.softmax(w2, axis=0)[:, None] * preds_nb, axis=0)
    assert out2.shape == (B2,)
    assert jnp.allclose(out2, ref2, atol=1e-5, rtol=1e-5)

    # --- Odd batch (not a multiple of 8): 2-D fallback path ------------------
    B3 = 300
    preds3 = jax.random.normal(jax.random.PRNGKey(3), (B3, N), dtype=jnp.float32)
    out3 = jax.block_until_ready(ensemble_predictor(w2, preds3, tile_elems=128))
    ref3 = jnp.sum(jax.nn.softmax(w2, axis=0) * preds3, axis=1)
    assert out3.shape == (B3,)
    assert jnp.allclose(out3, ref3, atol=1e-5, rtol=1e-5)

    # --- bf16 streaming, f32 in-kernel accumulation, optional bf16 output ----
    preds_bf16 = preds_nb.astype(jnp.bfloat16)
    out4 = jax.block_until_ready(
        ensemble_predictor_ensemble_major(w2, preds_bf16, out_dtype=jnp.bfloat16))
    ref4 = jnp.sum(jax.nn.softmax(w2, axis=0)[:, None]
                   * preds_bf16.astype(jnp.float32), axis=0)
    assert jnp.allclose(out4.astype(jnp.float32), ref4, atol=2e-2, rtol=2e-2)

    print("KERNEL_OK")
</pallas_src>

<mosaic_0001>
module attributes {stable_mosaic.version = 11 : i64} {
  func.func @_ensemble_kernel(%arg0: i32, %arg1: memref<4x1xf32, #tpu.memory_space<vmem>>, %arg2: memref<4x8x1xf32, #tpu.memory_space<vmem>>, %arg3: memref<8x1xf32, #tpu.memory_space<vmem>>) attributes {dimension_semantics = [#tpu.dimension_semantics<parallel>], iteration_bounds = array<i64: 1>, scalar_prefetch = 0 : i64, scratch_operands = 0 : i64, tpu.core_type = #tpu.core_type<tc>, window_params = [{pipeline_mode = #tpu.pipeline_mode<synchronous>, transform_indices = @transform_0, window_bounds = array<i64: 4, 1>}, {transform_indices = @transform_1, window_bounds = array<i64: 4, 8, 1>}, {transform_indices = @transform_2, window_bounds = array<i64: 8, 1>}]} {
    %c0 = arith.constant 0 : index
    %c0_0 = arith.constant 0 : index
    %0 = vector.load %arg1[%c0, %c0_0] : memref<4x1xf32, #tpu.memory_space<vmem>>, vector<4x1xf32>
    %cst = arith.constant dense<0xFF800000> : vector<1xf32>
    %1 = vector.multi_reduction <maximumf>, %0, %cst [0] : vector<4x1xf32> to vector<1xf32>
    %2 = vector.shape_cast %1 : vector<1xf32> to vector<1x1xf32>
    %3 = vector.broadcast %2 : vector<1x1xf32> to vector<4x1xf32>
    %4 = arith.subf %0, %3 : vector<4x1xf32>
    %5 = math.exp %4 : vector<4x1xf32>
    %cst_1 = arith.constant dense<0.000000e+00> : vector<1xf32>
    %6 = vector.multi_reduction <add>, %5, %cst_1 [0] : vector<4x1xf32> to vector<1xf32>
    %7 = vector.shape_cast %6 : vector<1xf32> to vector<1x1xf32>
    %8 = vector.broadcast %7 : vector<1x1xf32> to vector<4x1xf32>
    %9 = arith.divf %5, %8 : vector<4x1xf32>
    %10 = vector.shape_cast %9 : vector<4x1xf32> to vector<4x1x1xf32>
    %c0_2 = arith.constant 0 : index
    %c0_3 = arith.constant 0 : index
    %c0_4 = arith.constant 0 : index
    %11 = vector.load %arg2[%c0_2, %c0_3, %c0_4] : memref<4x8x1xf32, #tpu.memory_space<vmem>>, vector<4x8x1xf32>
    %12 = vector.broadcast %10 : vector<4x1x1xf32> to vector<4x8x1xf32>
    %13 = arith.mulf %12, %11 : vector<4x8x1xf32>
    %cst_5 = arith.constant dense<0.000000e+00> : vector<8x1xf32>
    %14 = vector.multi_reduction <add>, %13, %cst_5 [0] : vector<4x8x1xf32> to vector<8x1xf32>
    %c0_6 = arith.constant 0 : index
    %c0_7 = arith.constant 0 : index
    %15 = vector.load %arg3[%c0_6, %c0_7] : memref<8x1xf32, #tpu.memory_space<vmem>>, vector<8x1xf32>
    tpu.vector_store %arg3[%c0_6, %c0_7], %14 {strides = array<i32>} : memref<8x1xf32, #tpu.memory_space<vmem>>, vector<8x1xf32>,
    return
  }
  func.func @transform_0(%arg0: i32) -> (i32, i32) {
    %c0_i32 = arith.constant 0 : i32
    %c0_i32_0 = arith.constant 0 : i32
    %c0_i32_1 = arith.constant 0 : i32
    return %c0_i32, %c0_i32_0 : i32, i32
  }
  func.func @transform_1(%arg0: i32) -> (i32, i32, i32) {
    %c0_i32 = arith.constant 0 : i32
    %c0_i32_0 = arith.constant 0 : i32
    %c0_i32_1 = arith.constant 0 : i32
    return %c0_i32, %c0_i32_0, %arg0 : i32, i32, i32
  }
  func.func @transform_2(%arg0: i32) -> (i32, i32) {
    %c0_i32 = arith.constant 0 : i32
    %c0_i32_0 = arith.constant 0 : i32
    return %c0_i32, %arg0 : i32, i32
  }
}

</mosaic_0001>

<bundles_post_ra>
// kernel: tpu_custom_call.1
= control target key start
LH: loop header
LB: loop body
LE: loop exit
PB: predicated region body
PF: predicated region fallthrough
CT: control target
= control target key end

     0   :  { %vm12_vm0 = vcmask 3072   ;;  %v103_v18 = vmov 1966171168   ;;  %v36_v20 = vlaneseq  ;;  %vm85_vm1 = vcmask 7168   ;;  %s142_s0 = inlined_call_operand.vmem [shape: f32[4,1], index: 0, kind: input, shape index: {}]   ;;  %s143_s1 = inlined_call_operand.vmem [shape: f32[4,8,1], index: 1, kind: input, shape index: {}]   ;;  %s144_s2 = inlined_call_operand.vmem [shape: f32[8,1], index: 2, kind: output, shape index: {}]  }
   0x1   :  { %v11_v0 = vld [vmem:[%s142_s0] sm:$0xf]  ;;  %v34_v19 = vunpack.c.l.s4 %v103_v18  ;;  %v58_v34 = vld [vmem:[%s143_s1 + $0x8] sm:$0xff]  ;;  %v59_v35 = vld [vmem:[%s143_s1 + $0x10] sm:$0xff] }
   0x2   :  { %v13_v1 = vsel %vm12_vm0, %v11_v0, -inf  ;;  %v37_v22 = vshrl.u32 %v36_v20, 7  ;;  %v57_v30 = vld [vmem:[%s143_s1] sm:$0xff]  ;;  %v60_v40 = vld [vmem:[%s143_s1 + $0x18] sm:$0xff] }
   0x3   :  { %v14_v2 = vrot.slane %v13_v1, 4  ;;  %v35_v21 = vunpack.c.0.s8 %v34_v19 }
   0x4   :  { %v63_v27 = vsub.s32 0, %v37_v22 }
   0x5   :  { %v15_v3 = vmax.f32 %v13_v1, %v14_v2  ;;  %v38_v23 = vsub.s32 %v35_v21, %v37_v22 }
   0x7   :  { %v16_v4 = vrot.slane %v15_v3, 2 }
   0x9   :  { %v17_v5 = vmax.f32 %v15_v3, %v16_v4 }
   0xb   :  { %v18_v6 = vrot.slane %v17_v5, 1 }
   0xd   :  { %v19_v7 = vmax.f32 %v17_v5, %v18_v6 }
   0xf   :  { %v20_v8 = vsub.f32 %v11_v0, %v19_v7 }
  0x11   :  { %v21_v9 = vmul.f32 1.442695, %v20_v8 }
  0x13   :  { %99 = vpow2.f32 %v21_v9 }
  0x20   :  { %v100_v10 = vpop.eup %99 }
  0x21   :  { %v23_v11 = vsel %vm12_vm0, %v100_v10, 0.0 }
  0x22   :  { %v24_v12 = vrot.slane %v23_v11, 4 }
  0x24   :  { %v25_v13 = vadd.f32 %v24_v12, %v23_v11 }
  0x26   :  { %v26_v14 = vrot.slane %v25_v13, 2 }
  0x28   :  { %v27_v15 = vadd.f32 %v26_v14, %v25_v13 }
  0x2a   :  { %v28_v16 = vrot.slane %v27_v15, 1 }
  0x2c   :  { %v29_v17 = vadd.f32 %v28_v16, %v27_v15 }
  0x2e   :  { %101 = vrcp.f32 %v29_v17 }
  0x3b   :  { %v102_v24 = vpop.eup %101 }
  0x3c   :  { %v31_v25 = vmul.f32 %v102_v24, %v100_v10 }
  0x3e   :  { %v39_v26 = vrot.slane %v31_v25, %v38_v23 }
  0x40   :  { %v40_v28 = vcombine.high %v39_v26, %v39_v26  ;;  %v47_v29 = vrot.slane %v39_v26, %v38_v23 }
  0x42   :  { %v54_v31 = vrot.slane %v40_v28, %v38_v23  ;;  %v55_v32 = vcombine.high %v47_v29, %v47_v29  ;;  %v64_v33 = vrot.slane %v47_v29, %v63_v27 }
  0x44   :  { %v56_v36 = vcombine.high %v54_v31, %v54_v31  ;;  %v68_v37 = vrot.slane %v54_v31, %v63_v27  ;;  %v72_v38 = vrot.slane %v55_v32, %v63_v27  ;;  %v81_v39 = vmul.f32 %v64_v33, %v57_v30 }
  0x46   :  { %v76_v41 = vrot.slane %v56_v36, %v63_v27  ;;  %v82_v42 = vmul.f32 %v68_v37, %v58_v34  ;;  %v83_v43 = vmul.f32 %v72_v38, %v59_v35  ;;  %v86_v44 = vsel %vm85_vm1, %v81_v39, 0.0 }
  0x48   :  { %v84_v45 = vmul.f32 %v76_v41, %v60_v40  ;;  %v87_v46 = vsel %vm85_vm1, %v82_v42, 0.0  ;;  %v89_v47 = vsel %vm85_vm1, %v83_v43, 0.0 }
  0x49   :  { %v88_v48 = vadd.f32 %v87_v46, %v86_v44 }
  0x4a   :  { %v91_v49 = vsel %vm85_vm1, %v84_v45, 0.0 }
  0x4b   :  { %v90_v50 = vadd.f32 %v89_v47, %v88_v48 }
  0x4d   :  { %v92_v51 = vadd.f32 %v91_v49, %v90_v50 }
  0x4f   :  { %93 = vst.msk [vmem:[%s144_s2] sm:$0xff] %vm85_vm1, %v92_v51 }

</bundles_post_ra>
